<compile_context>
chip_gen: v5e
topology: v5e:2x2
jax: 0.10.0
libtpu: 0.0.40
codegen_flags: <defaults>
</compile_context>

<pallas_src>
import jax
import jax.numpy as jnp
from jax.experimental import pallas as pl
from jax.experimental.pallas import tpu as pltpu


def _round_up(x, m):
    return ((x + m - 1) // m) * m


# --------------------------------------------------------------------------------------
# Kernels
# --------------------------------------------------------------------------------------

def ffn_kernel_f32_out(x_ref, w1_ref, b1_ref, w2_ref, b2_ref, o_ref):
    """f32 output: accumulate directly into the resident output block (no scratch)."""
    j = pl.program_id(1)

    @pl.when(j == 0)
    def _():
        # Fold b2 into the accumulator init.
        o_ref[...] = jnp.broadcast_to(b2_ref[...].astype(jnp.float32), o_ref.shape)

    h = jnp.dot(x_ref[...], w1_ref[...], preferred_element_type=jnp.float32)
    h = jnp.maximum(h + b1_ref[...].astype(jnp.float32), 0.0)
    o_ref[...] += jnp.dot(h.astype(w2_ref.dtype), w2_ref[...],
                          preferred_element_type=jnp.float32)


def ffn_kernel_acc(x_ref, w1_ref, b1_ref, w2_ref, b2_ref, o_ref, acc_ref):
    """Narrow output dtypes (bf16 etc.): f32 scratch accumulator, cast on last chunk."""
    j = pl.program_id(1)

    @pl.when(j == 0)
    def _():
        acc_ref[...] = jnp.broadcast_to(b2_ref[...].astype(jnp.float32), acc_ref.shape)

    h = jnp.dot(x_ref[...], w1_ref[...], preferred_element_type=jnp.float32)
    h = jnp.maximum(h + b1_ref[...].astype(jnp.float32), 0.0)
    acc_ref[...] += jnp.dot(h.astype(w2_ref.dtype), w2_ref[...],
                            preferred_element_type=jnp.float32)

    @pl.when(j == pl.num_programs(1) - 1)
    def _():
        o_ref[...] = acc_ref[...].astype(o_ref.dtype)


# --------------------------------------------------------------------------------------
# Tiling / VMEM heuristics
# --------------------------------------------------------------------------------------

def _vmem_est(tm, th, dp, x_isz, w_isz, o_isz, use_scratch):
    """Rough resident-VMEM estimate for one grid step (double-buffered tiles)."""
    use = 2 * tm * dp * x_isz              # x row tile
    use += 2 * tm * dp * o_isz             # output row tile
    if use_scratch:
        use += tm * dp * 4                 # f32 accumulator scratch
    use += 2 * (dp * th + th) * w_isz      # W1 column chunk + b1 chunk
    use += 2 * (th * dp + dp) * w_isz      # W2 row chunk + b2
    return use


def _pick_tiles(N, dp, hp, x_isz, w_isz, o_isz, use_scratch, row_align, budget):
    """Largest tm first (dominant lever: cuts weight re-streaming), then largest th."""
    tm_cap = max(row_align, _round_up(N, row_align))
    tm_cands = sorted({min(c, tm_cap) for c in (1024, 512, 256, 128, 64, 32, 16, 8)
                       if min(c, tm_cap) % row_align == 0}, reverse=True)
    if not tm_cands:
        tm_cands = [tm_cap]
    # Prefer keeping the full hidden dim resident (single reduction step), then halve.
    th_cands = [hp] + [c for c in (2048, 1024, 512, 256, 128) if c < hp and hp % c == 0]
    for tm in tm_cands:
        for th in th_cands:
            if _vmem_est(tm, th, dp, x_isz, w_isz, o_isz, use_scratch) <= budget:
                return tm, th
    return tm_cands[-1], th_cands[-1]


# --------------------------------------------------------------------------------------
# Wrapper
# --------------------------------------------------------------------------------------

def positionwise_ffn(x, w1, b1, w2, b2):
    """x: (batch, seq, d_model) -> (batch, seq, d_model).

    Weights are stored pre-transposed as (in_features, out_features):
      w1: (d_model, hidden), b1: (hidden,), w2: (hidden, d_model), b2: (d_model,).
    """
    batch, seq, d_model = x.shape
    hidden = w1.shape[1]
    N = batch * seq

    x_isz = jnp.dtype(x.dtype).itemsize
    w_isz = jnp.dtype(w1.dtype).itemsize
    o_isz = x_isz
    use_scratch = x.dtype != jnp.float32   # f32 outputs accumulate directly in o_ref

    # Sublane packing: f32 -> 8 rows, bf16 -> 16, int8/fp8 -> 32.
    row_align = max(8, 32 // max(x_isz, 1))

    # Lane-dense feature dims (multiples of 128); exact (zero) padding for this op.
    dp = _round_up(d_model, 128)
    hp = _round_up(hidden, 128)

    # Per-generation VMEM capacity and caps.
    try:
        vmem_cap = int(pltpu.get_tpu_info().vmem_capacity_bytes)
    except Exception:
        vmem_cap = 64 * 1024 * 1024        # conservative fallback (v7x per-TC)
    gen_cap = max(32 * 1024 * 1024,
                  min(int(vmem_cap * 0.80), vmem_cap - 12 * 1024 * 1024))
    tile_budget = int(gen_cap * 0.90)

    tm, th = _pick_tiles(N, dp, hp, x_isz, w_isz, o_isz, use_scratch,
                         row_align, tile_budget)

    # Keep >=2 row tiles so both TensorCores get work on v7x megacore.
    Np = _round_up(N, tm)
    if Np // tm == 1 and tm >= 2 * row_align:
        tm = _round_up(max(row_align, tm // 2), row_align)
        Np = _round_up(N, tm)

    # Pad only when needed (aligned transformer shapes take the zero-copy path).
    x_flat = x.reshape(N, d_model)
    if Np == N and dp == d_model:
        x2 = x_flat
    else:
        x2 = jnp.zeros((Np, dp), x.dtype).at[:N, :d_model].set(x_flat)
    if dp == d_model and hp == hidden:
        # NOTE: for misaligned dims, callers in a training loop should pre-pad weights
        # once outside the forward pass; here we only pad when strictly necessary.
        w1p, b1p, w2p, b2p = w1, b1.reshape(1, hidden), w2, b2.reshape(1, d_model)
    else:
        w1p = jnp.zeros((dp, hp), w1.dtype).at[:d_model, :hidden].set(w1)
        b1p = jnp.zeros((1, hp), b1.dtype).at[0, :hidden].set(b1)
        w2p = jnp.zeros((hp, dp), w2.dtype).at[:hidden, :d_model].set(w2)
        b2p = jnp.zeros((1, dp), b2.dtype).at[0, :d_model].set(b2)

    grid = (Np // tm, hp // th)

    est = _vmem_est(tm, th, dp, x_isz, w_isz, o_isz, use_scratch)
    # Always >= 32 MiB (covers v5e's 16 MiB default scoped limit) and never above the
    # generation cap (stays inside v7x's 64 MiB physical VMEM).
    vmem_limit = min(gen_cap, max(32 * 1024 * 1024, int(est * 1.5)))

    in_specs = [
        pl.BlockSpec((tm, dp), lambda i, j: (i, 0)),   # x row tile (invariant in j)
        pl.BlockSpec((dp, th), lambda i, j: (0, j)),   # W1 column chunk
        pl.BlockSpec((1, th), lambda i, j: (0, j)),    # b1 chunk
        pl.BlockSpec((th, dp), lambda i, j: (j, 0)),   # W2 row chunk
        pl.BlockSpec((1, dp), lambda i, j: (0, 0)),    # b2 (grid-invariant)
    ]
    out_spec = pl.BlockSpec((tm, dp), lambda i, j: (i, 0))

    if use_scratch:
        kernel = ffn_kernel_acc
        scratch_shapes = [pltpu.VMEM((tm, dp), jnp.float32)]
    else:
        kernel = ffn_kernel_f32_out
        scratch_shapes = []

    out = pl.pallas_call(
        kernel,
        out_shape=jax.ShapeDtypeStruct((Np, dp), x.dtype),
        grid_spec=pltpu.PrefetchScalarGridSpec(
            num_scalar_prefetch=0,
            grid=grid,
            in_specs=in_specs,
            out_specs=out_spec,
            scratch_shapes=scratch_shapes,
        ),
        compiler_params=pltpu.CompilerParams(
            dimension_semantics=("parallel", "arbitrary"),
            vmem_limit_bytes=vmem_limit,
        ),
    )(x2, w1p, b1p, w2p, b2p)

    if Np == N and dp == d_model:
        return out.reshape(batch, seq, d_model)
    return out[:N, :d_model].reshape(batch, seq, d_model)


def init_params(key, d_model, hidden, dtype=jnp.float32):
    """Deterministic init matching nn.Linear's U(-1/sqrt(fan_in), 1/sqrt(fan_in)).
    Weights are returned already transposed to (in_features, out_features)."""
    k1, k2, k3, k4 = jax.random.split(key, 4)
    lim1 = 1.0 / jnp.sqrt(d_model)
    lim2 = 1.0 / jnp.sqrt(hidden)
    w1 = jax.random.uniform(k1, (d_model, hidden), dtype, -lim1, lim1)
    b1 = jax.random.uniform(k2, (hidden,), dtype, -lim1, lim1)
    w2 = jax.random.uniform(k3, (hidden, d_model), dtype, -lim2, lim2)
    b2 = jax.random.uniform(k4, (d_model,), dtype, -lim2, lim2)
    return w1, b1, w2, b2


if __name__ == "__main__":
    key = jax.random.PRNGKey(0)
    batch, seq, d_model, hidden = 2, 8, 32, 64

    kx, kp = jax.random.split(key)
    x = jax.random.normal(kx, (batch, seq, d_model), jnp.float32)
    w1, b1, w2, b2 = init_params(kp, d_model, hidden)

    # f32 path (direct accumulation into the output block, no scratch).
    y = positionwise_ffn(x, w1, b1, w2, b2)
    y = jax.block_until_ready(y)

    ref = jnp.maximum(x @ w1 + b1, 0.0) @ w2 + b2
    assert y.shape == x.shape
    assert jnp.allclose(y, ref, atol=1e-5, rtol=1e-5)

    # bf16 path (exercises the f32-scratch variant; recommended on v6e/v7x MXU).
    xb = x.astype(jnp.bfloat16)
    wb = tuple(p.astype(jnp.bfloat16) for p in (w1, b1, w2, b2))
    yb = positionwise_ffn(xb, *wb)
    yb = jax.block_until_ready(yb)
    assert yb.shape == x.shape
    assert jnp.allclose(yb.astype(jnp.float32), ref, atol=1.5e-1, rtol=5e-2)

    print("KERNEL_OK")
</pallas_src>

<mosaic_0001>
module attributes {stable_mosaic.version = 11 : i64} {
  func.func @ffn_kernel_f32_out(%arg0: i32, %arg1: i32, %arg2: memref<8x128xf32, #tpu.memory_space<vmem>>, %arg3: memref<128x128xf32, #tpu.memory_space<vmem>>, %arg4: memref<1x128xf32, #tpu.memory_space<vmem>>, %arg5: memref<128x128xf32, #tpu.memory_space<vmem>>, %arg6: memref<1x128xf32, #tpu.memory_space<vmem>>, %arg7: memref<8x128xf32, #tpu.memory_space<vmem>>) attributes {dimension_semantics = [#tpu.dimension_semantics<parallel>, #tpu.dimension_semantics<arbitrary>], iteration_bounds = array<i64: 2, 1>, scalar_prefetch = 0 : i64, scratch_operands = 0 : i64, tpu.core_type = #tpu.core_type<tc>, window_params = [{transform_indices = @transform_0, window_bounds = array<i64: 8, 128>}, {transform_indices = @transform_1, window_bounds = array<i64: 128, 128>}, {transform_indices = @transform_2, window_bounds = array<i64: 1, 128>}, {transform_indices = @transform_3, window_bounds = array<i64: 128, 128>}, {pipeline_mode = #tpu.pipeline_mode<synchronous>, transform_indices = @transform_4, window_bounds = array<i64: 1, 128>}, {transform_indices = @transform_5, window_bounds = array<i64: 8, 128>}]} {
    %c0_i32 = arith.constant 0 : i32
    %0 = arith.cmpi eq, %arg1, %c0_i32 : i32
    %1 = arith.extui %0 : i1 to i32
    %c0_i32_0 = arith.constant 0 : i32
    %2 = arith.cmpi ne, %1, %c0_i32_0 : i32
    scf.if %2 {
      %c0_14 = arith.constant 0 : index
      %c0_15 = arith.constant 0 : index
      %16 = vector.load %arg6[%c0_14, %c0_15] : memref<1x128xf32, #tpu.memory_space<vmem>>, vector<1x128xf32>
      %17 = vector.shape_cast %16 : vector<1x128xf32> to vector<1x128xf32>
      %18 = vector.broadcast %17 : vector<1x128xf32> to vector<8x128xf32>
      %c0_16 = arith.constant 0 : index
      %c0_17 = arith.constant 0 : index
      %19 = vector.load %arg7[%c0_16, %c0_17] : memref<8x128xf32, #tpu.memory_space<vmem>>, vector<8x128xf32>
      tpu.vector_store %arg7[%c0_16, %c0_17], %18 {strides = array<i32>} : memref<8x128xf32, #tpu.memory_space<vmem>>, vector<8x128xf32>,
    } else {
    }
    %c0 = arith.constant 0 : index
    %c0_1 = arith.constant 0 : index
    %3 = vector.load %arg2[%c0, %c0_1] : memref<8x128xf32, #tpu.memory_space<vmem>>, vector<8x128xf32>
    %c0_2 = arith.constant 0 : index
    %c0_3 = arith.constant 0 : index
    %4 = vector.load %arg3[%c0_2, %c0_3] : memref<128x128xf32, #tpu.memory_space<vmem>>, vector<128x128xf32>
    %cst = arith.constant dense<0.000000e+00> : vector<8x128xf32>
    %5 = tpu.matmul %3, %4, %cst {dimension_numbers = #tpu.dot_dimension_numbers<[1], [0], [0], [1], [0, 0, 1, 1], [], []>} : vector<8x128xf32>, vector<128x128xf32>, vector<8x128xf32> -> vector<8x128xf32>
    %c0_4 = arith.constant 0 : index
    %c0_5 = arith.constant 0 : index
    %6 = vector.load %arg4[%c0_4, %c0_5] : memref<1x128xf32, #tpu.memory_space<vmem>>, vector<1x128xf32>
    %7 = vector.broadcast %6 : vector<1x128xf32> to vector<8x128xf32>
    %8 = arith.addf %5, %7 : vector<8x128xf32>
    %cst_6 = arith.constant 0.000000e+00 : f32
    %9 = vector.broadcast %cst_6 : f32 to vector<8x128xf32>
    %10 = arith.maximumf %8, %9 : vector<8x128xf32>
    %c0_7 = arith.constant 0 : index
    %c0_8 = arith.constant 0 : index
    %11 = vector.load %arg7[%c0_7, %c0_8] : memref<8x128xf32, #tpu.memory_space<vmem>>, vector<8x128xf32>
    %c0_9 = arith.constant 0 : index
    %c0_10 = arith.constant 0 : index
    %12 = vector.load %arg5[%c0_9, %c0_10] : memref<128x128xf32, #tpu.memory_space<vmem>>, vector<128x128xf32>
    %cst_11 = arith.constant dense<0.000000e+00> : vector<8x128xf32>
    %13 = tpu.matmul %10, %12, %cst_11 {dimension_numbers = #tpu.dot_dimension_numbers<[1], [0], [0], [1], [0, 0, 1, 1], [], []>} : vector<8x128xf32>, vector<128x128xf32>, vector<8x128xf32> -> vector<8x128xf32>
    %14 = arith.addf %11, %13 : vector<8x128xf32>
    %c0_12 = arith.constant 0 : index
    %c0_13 = arith.constant 0 : index
    %15 = vector.load %arg7[%c0_12, %c0_13] : memref<8x128xf32, #tpu.memory_space<vmem>>, vector<8x128xf32>
    tpu.vector_store %arg7[%c0_12, %c0_13], %14 {strides = array<i32>} : memref<8x128xf32, #tpu.memory_space<vmem>>, vector<8x128xf32>,
    return
  }
  func.func @transform_0(%arg0: i32, %arg1: i32) -> (i32, i32) {
    %c0_i32 = arith.constant 0 : i32
    %c0_i32_0 = arith.constant 0 : i32
    return %arg0, %c0_i32 : i32, i32
  }
  func.func @transform_1(%arg0: i32, %arg1: i32) -> (i32, i32) {
    %c0_i32 = arith.constant 0 : i32
    %c0_i32_0 = arith.constant 0 : i32
    return %c0_i32, %arg1 : i32, i32
  }
  func.func @transform_2(%arg0: i32, %arg1: i32) -> (i32, i32) {
    %c0_i32 = arith.constant 0 : i32
    %c0_i32_0 = arith.constant 0 : i32
    return %c0_i32, %arg1 : i32, i32
  }
  func.func @transform_3(%arg0: i32, %arg1: i32) -> (i32, i32) {
    %c0_i32 = arith.constant 0 : i32
    %c0_i32_0 = arith.constant 0 : i32
    return %arg1, %c0_i32 : i32, i32
  }
  func.func @transform_4(%arg0: i32, %arg1: i32) -> (i32, i32) {
    %c0_i32 = arith.constant 0 : i32
    %c0_i32_0 = arith.constant 0 : i32
    %c0_i32_1 = arith.constant 0 : i32
    return %c0_i32, %c0_i32_0 : i32, i32
  }
  func.func @transform_5(%arg0: i32, %arg1: i32) -> (i32, i32) {
    %c0_i32 = arith.constant 0 : i32
    %c0_i32_0 = arith.constant 0 : i32
    return %arg0, %c0_i32 : i32, i32
  }
}

</mosaic_0001>

<bundles_post_ra>
// kernel: tpu_custom_call.1
= control target key start
LH: loop header
LB: loop body
LE: loop exit
PB: predicated region body
PF: predicated region fallthrough
CT: control target
= control target key end

     0   :  { %10 = vsyncpa [#allocation3], 0  ;;  %s1010_s0 = inlined_call_operand.hbm [shape: f32[16,128], index: 0, kind: input, shape index: {}]   ;;  %s1011_s1 = inlined_call_operand.hbm [shape: f32[128,128], index: 1, kind: input, shape index: {}]   ;;  %s1012_s2 = inlined_call_operand.vmem [shape: f32[1,128], index: 2, kind: input, shape index: {}]   ;;  %s1013_s3 = inlined_call_operand.hbm [shape: f32[128,128], index: 3, kind: input, shape index: {}]   ;;  %s1014_s4 = inlined_call_operand.vmem [shape: f32[1,128], index: 4, kind: input, shape index: {}]   ;;  %s1015_s5 = inlined_call_operand.hbm [shape: f32[16,128], index: 5, kind: output, shape index: {}]  }
   0x1   :  { %12 = vsyncpa [#allocation3 + $0x1], 0 }
   0x2   :  { %13 = vsyncpa [#allocation6], 0 }
   0x3   :  { %14 = vsyncpa [#allocation4], 0 }
   0x4   :  { %16 = vsyncpa [#allocation4 + $0x1], 0  ;;  %s853_s18 = smov 0   ;;  %s855_s19 = smov 0  }
   0x5   :  { %s857_s20 = smov 0   ;;  %s859_s21 = smov 0  }
   0x6   :  { %s861_s22 = smov 0   ;;  %s863_s23 = smov 0  }
   0x7 LB: > { %s536_s24 = sadd.s32 4294967295, %s817_s23   ;;  %p538_p0 = scmp.ge.s32.totalorder %s817_s23, 1  ;;  %s817_s23 = sphi %s863_s23, %s22_s23   ;;  %s813_s22 = sphi %s861_s22, %s1025_s22   ;;  %s809_s21 = sphi %s859_s21, %s1024_s21   ;;  %s805_s20 = sphi %s857_s20, %s1023_s20   ;;  %s801_s19 = sphi %s855_s19, %s1022_s19   ;;  %s797_s18 = sphi %s853_s18, %s1021_s18  }
   0x8   : > { %p887_p1 = scmp.eq.s32.totalorder %s536_s24, 0  ;;  %p190_p2 = scmp.lt.s32.totalorder %s817_s23, 3 }
   0x9   : > { %s203_s28 = sshll.u32 %s1011_s1, 4  ;;  %s819_s30 = smov [#allocation5]   ;;  %s204_s28 = int_to_ptr.hbm [resolvable:$true] %s203_s28 }
   0xa   : > { %p895_p3 = pnand %p538_p0, %p190_p2  ;;  %s205_s6 = sshll.u32 %s819_s30, 4  ;;  %s206_s6 = int_to_ptr.vmem [resolvable:$true] %s205_s6 }
   0xb   : > { %p542_p6 = scmp.ge.s32.totalorder %s817_s23, 2  ;;  %s226_s9 = sshll.u32 %s1013_s3, 4  ;;  %s227_s9 = int_to_ptr.hbm [resolvable:$true] %s226_s9 }
   0xc   : > { %p566_p4 = pneg %p895_p3  ;;  %s820_s10 = smov 128  }
   0xd   : > { %s821_s11 = smov 8   ;;  %s822_s12 = smov [#allocation7]  }
   0xe   : > { %p567_p5 = pnand %p566_p4, %p887_p1  ;;  %s228_s13 = sshll.u32 %s822_s12, 4  ;;  %s229_s13 = int_to_ptr.vmem [resolvable:$true] %s228_s13 }
   0xf   : > { %s34_s14 = sadd.s32 1, %s813_s22  ;;  %s537_s15 = sadd.s32 4294967294, %s817_s23  }
  0x10   : > { %569 = dma.hbm_to_vmem [thread:$0]  (!%p567_p5), %s204_s28, 2048, %s206_s6, [#allocation6], %s820_s10, %s820_s10, %s821_s11  }
  0x11   : > { %572 = dma.hbm_to_vmem [thread:$0]  (!%p567_p5), %s227_s9, 2048, %s229_s13, [#allocation6], %s820_s10, %s820_s10, %s821_s11  }
  0x12   : > { %p36_p7 = scmp.ge.s32.totalorder %s34_s14, 2  ;;  %s41_s16 = sadd.s32 1, %s805_s20 }
  0x13   : > { %p48_p8 = scmp.ne.s32.totalorder %s805_s20, %s801_s19  ;;  %p49_p9 = scmp.eq.s32.totalorder %s817_s23, 0 }
  0x14   : > { %s1027_s14 = smov (%p36_p7, %s34_s14), 0  ;;  %p54_p10 = scmp.ne.s32.totalorder %s801_s19, %s797_s18 }
  0x15   : > { %s38_s17 = ssub.s32 %s813_s22, %s1027_s14  ;;  %p177_p11 = scmp.eq.s32.totalorder %s536_s24, 1 }
  0x16   : > { %p39_p12 = scmp.eq.s32.totalorder %s38_s17, 0  ;;  %p923_p13 = por %p887_p1, %p54_p10 }
  0x17   : > { %p927_p0 = por %p177_p11, %p48_p8  ;;  %p183_p2 = scmp.eq.s32.totalorder %s537_s15, 1 }
  0x18   : > { %s932_s28 = scalar_select %p39_p12, %s805_s20, %s41_s16  }
  0x19   : > { %p50_p4 = por %p49_p9, %p48_p8  ;;  %p934_p5 = por %p183_p2, %p54_p10 }
  0x1a   : > { %s245_s6 = sand.u32 1, %s805_s20   ;;  %s544_s24 = sshll.u32 %s813_s22, 3 }
  0x1b   : > { %p583_p7 = scmp.lt.s32.totalorder %s817_s23, 2  ;;  %s543_s7 = sshll.u32 %s245_s6, 3 }
  0x1c   : > { %s253_s10 = scalar_lea.hbm %s1010_s0, %s544_s24  ;;  %s249_s12 = scalar_lea.vmem [#allocation2], %s543_s7 }
  0x1d   : > { %s255_s11 = sshll.u32 %s253_s10, 4  ;;  %s257_s13 = sshll.u32 %s249_s12, 4  ;;  %s256_s11 = int_to_ptr.hbm [resolvable:$true] %s255_s11  ;;  %s258_s13 = int_to_ptr.vmem [resolvable:$true] %s257_s13 }
  0x1e   : > { %p574_p11 = pnand %p583_p7, %p50_p4  ;;  %s246_s15 = scalar_lea.sflag [#allocation3], %s245_s6 }
  0x1f   : > { %266 = sbr.rel (%p895_p3) target bundleno = 332 (0x14c), region = 40  ;;  %s947_s16 = sand.u32 (!%p895_p3), 1, %s801_s19  }
  0x20   : > { %576 = dma.hbm_to_vmem [thread:$0]  (!%p574_p11), %s256_s11, 128, %s258_s13, %s246_s15  }
  0x21   : > { %s546_s17 = sshll.u32 (!%p895_p3), %s947_s16, 3  ;;  %s269_s24 = scalar_lea.sflag (!%p895_p3), [#allocation3], %s947_s16 }
  0x22   : > { %s953_s7 = scalar_lea.vmem (!%p895_p3), [#allocation2], %s546_s17 }
  0x24   : > { %784 = dma.done.wait (%p923_p13), %s269_s24, 128  }
  0x25   : > { %786 = vsyncadd (%p923_p13), %s269_s24, 4294967168 }
  0x26   : > { %788 = dma.done.wait (%p887_p1), [#allocation6], 4096  }
  0x27   : > { %790 = vsyncadd (%p887_p1), [#allocation6], 4294963200  ;;  %v342_v0 = vld [vmem:[#allocation5 + $0x78] sm:$0xff]  ;;  %v341_v1 = vld [vmem:[#allocation5 + $0x70] sm:$0xff]  ;;  %s551_s26 = sshll.u32 %s809_s21, 3  ;;  %s312_s12 = scalar_lea.vmem [#allocation8], %s546_s17 }
  0x28   : > { %347 = vmatpush.msra.mxu0 %v342_v0  ;;  %v340_v2 = vld [vmem:[#allocation5 + $0x68] sm:$0xff]  ;;  %v339_v3 = vld [vmem:[#allocation5 + $0x60] sm:$0xff]  ;;  %v384_v4 = vld [vmem:[#allocation7 + $0x78] sm:$0xff]  ;;  %s418_s9 = scalar_lea.hbm %s1015_s5, %s551_s26  ;;  %s420_s13 = sshll.u32 %s312_s12, 4  ;;  %s421_s13 = int_to_ptr.vmem [resolvable:$true] %s420_s13 }
  0x29   : > { %v338_v5 = vld [vmem:[#allocation5 + $0x58] sm:$0xff]  ;;  %385 = vmatpush.msra.mxu1 %v384_v4  ;;  %v383_v6 = vld [vmem:[#allocation7 + $0x70] sm:$0xff]  ;;  %v382_v7 = vld [vmem:[#allocation7 + $0x68] sm:$0xff]  ;;  %s422_s15 = sshll.u32 %s418_s9, 4  ;;  %s408_s24 = scalar_lea.sflag [#allocation4], %s947_s16  ;;  %s423_s15 = int_to_ptr.hbm [resolvable:$true] %s422_s15 }
  0x2a   : > { %348 = vmatpush.msra.mxu0 %v341_v1  ;;  %v337_v8 = vld [vmem:[#allocation5 + $0x50] sm:$0xff]  ;;  %v381_v9 = vld [vmem:[#allocation7 + $0x60] sm:$0xff]  ;;  %v336_v10 = vld [vmem:[#allocation5 + $0x48] sm:$0xff]  ;;  %s745_s21 = sshra.s32 %s423_s15, 4  ;;  %s751_s26 = scalar_lea.hbm %s1015_s5, 16  ;;  %s746_s21 = int_to_ptr.hbm [resolvable:$true] %s745_s21 }
  0x2b   : > { %386 = vmatpush.msra.mxu1 %v383_v6  ;;  %v380_v11 = vld [vmem:[#allocation7 + $0x58] sm:$0xff]  ;;  %v335_v12 = vld [vmem:[#allocation5 + $0x40] sm:$0xff]  ;;  %v379_v13 = vld [vmem:[#allocation7 + $0x50] sm:$0xff]  ;;  %p752_p9 = scmp.lt.s32.totalorder %s746_s21, %s1015_s5 }
  0x2c   : > { %349 = vmatpush.msra.mxu0 %v340_v2  ;;  %v334_v14 = vld [vmem:[#allocation5 + $0x38] sm:$0xff]  ;;  %v378_v15 = vld [vmem:[#allocation7 + $0x48] sm:$0xff]  ;;  %v333_v16 = vld [vmem:[#allocation5 + $0x30] sm:$0xff] }
  0x2d   : > { %387 = vmatpush.msra.mxu1 %v382_v7  ;;  %v377_v17 = vld [vmem:[#allocation7 + $0x40] sm:$0xff]  ;;  %v332_v18 = vld [vmem:[#allocation5 + $0x28] sm:$0xff]  ;;  %v376_v19 = vld [vmem:[#allocation7 + $0x38] sm:$0xff] }
  0x2e   : > { %350 = vmatpush.msra.mxu0 %v339_v3  ;;  %v331_v20 = vld [vmem:[#allocation5 + $0x20] sm:$0xff]  ;;  %v375_v21 = vld [vmem:[#allocation7 + $0x30] sm:$0xff]  ;;  %v330_v22 = vld [vmem:[#allocation5 + $0x18] sm:$0xff] }
  0x2f   : > { %388 = vmatpush.msra.mxu1 %v381_v9  ;;  %v374_v23 = vld [vmem:[#allocation7 + $0x28] sm:$0xff]  ;;  %v329_v24 = vld [vmem:[#allocation5 + $0x10] sm:$0xff]  ;;  %v373_v25 = vld [vmem:[#allocation7 + $0x20] sm:$0xff] }
  0x30   : > { %351 = vmatpush.msra.mxu0 %v338_v5  ;;  %v328_v26 = vld [vmem:[#allocation5 + $0x8] sm:$0xff]  ;;  %v372_v27 = vld [vmem:[#allocation7 + $0x18] sm:$0xff]  ;;  %v327_v28 = vld [vmem:[#allocation5] sm:$0xff] }
  0x31   : > { %389 = vmatpush.msra.mxu1 %v380_v11  ;;  %v326_v29 = vld [vmem:[%s953_s7] sm:$0xff]  ;;  %v370_v31 = vld [vmem:[#allocation7 + $0x8] sm:$0xff]  ;;  %v369_v32 = vld [vmem:[#allocation7] sm:$0xff]  ;;  %s747_s7 = scalar_lea.hbm %s746_s21, 8 }
  0x32   : > { %352 = vmatpush.msra.mxu0 %v337_v8  ;;  %v371_v30 = vld [vmem:[#allocation7 + $0x10] sm:$0xff]  ;;  %p748_p1 = scmp.ne.s32.totalorder %s746_s21, %s747_s7  ;;  %p753_p10 = scmp.lt.s32.totalorder %s751_s26, %s747_s7 }
  0x33   : > { %390 = vmatpush.msra.mxu1 %v379_v13  ;;  %v639_v33 = vld [vmem:[%s1012_s2] ss:$0 sm:$0xff] }
  0x34   : > { %353 = vmatpush.msra.mxu0 %v336_v10  ;;  %v640_v37 = vld [vmem:[%s1014_s4] ss:$0 sm:$0xff]  ;;  %p749_p3 = pnand %p748_p1, %p927_p0  ;;  %p754_p12 = por %p753_p10, %p752_p9 }
  0x35   : > { %391 = vmatpush.msra.mxu1 %v378_v15 }
  0x36   : > { %354 = vmatpush.msra.mxu0 %v335_v12  ;;  %p750_p8 = pneg %p749_p3 }
  0x37   : > { %392 = vmatpush.msra.mxu1 %v377_v17 }
  0x38   : > { %355 = vmatpush.msra.mxu0 %v334_v14  ;;  %p755_p13 = pnand %p754_p12, %p750_p8 }
  0x39   : > { %393 = vmatpush.msra.mxu1 %v376_v19 }
  0x3a   : > { %356 = vmatpush.msra.mxu0 %v333_v16 }
  0x3b   : > { %394 = vmatpush.msra.mxu1 %v375_v21 }
  0x3c   : > { %357 = vmatpush.msra.mxu0 %v332_v18 }
  0x3d   : > { %395 = vmatpush.msra.mxu1 %v374_v23 }
  0x3e   : > { %358 = vmatpush.msra.mxu0 %v331_v20 }
  0x3f   : > { %396 = vmatpush.msra.mxu1 %v373_v25 }
  0x40   : > { %359 = vmatpush.msra.mxu0 %v330_v22 }
  0x41   : > { %397 = vmatpush.msra.mxu1 %v372_v27 }
  0x42   : > { %360 = vmatpush.msra.mxu0 %v329_v24 }
  0x43   : > { %398 = vmatpush.msra.mxu1 %v371_v30 }
  0x44   : > { %361 = vmatpush.msra.mxu0 %v328_v26 }
  0x45   : > { %399 = vmatpush.msra.mxu1 %v370_v31 }
  0x46   : > { %362 = vmatpush.msra.mxu0 %v327_v28 }
  0x47   : > { %363 = vmatmul.f32.vlgmr.msra.gmra.mxu0 %v326_v29  ;;  %400 = vmatpush.msra.mxu1 %v369_v32 }
  0xc4   : > { %v364_v34 = vpop.f32.mrf.mxu0 }
  0xc5   : > { %v365_v35 = vadd.f32 %v639_v33, %v364_v34 }
  0xc7   : > { %v367_v36 = vmax.f32 %v365_v35, 0.0 }
  0xc9   : > { %401 = vmatmul.f32.vlgmr.msra.gmra.mxu1 %v367_v36 }
 0x146   : > { %v402_v38 = vpop.f32.mrf.mxu1 }
 0x147   : > { %v405_v39 = vadd.f32 %v640_v37, %v402_v38 }
 0x149   : > { %406 = vst [vmem:[%s312_s12] sm:$0xff] %v405_v39 }
 0x14a   : > { %758 = shalt.err (!%p755_p13)
}
 0x14b   : > { %564 = dma.vmem_to_hbm [thread:$0]  (%p927_p0), %s421_s13, 128, %s423_s15, %s408_s24  }
 0x14c PF: > { %s434_s16 = sand.u32 1, %s797_s18   ;;  %p578_p2 = pnand %p542_p6, %p934_p5 }
 0x14d   : > { %s435_s8 = scalar_lea.sflag [#allocation4], %s434_s16 }
 0x14e   : > { %p579_p4 = pneg %p578_p2 }
 0x150   : > { %792 = dma.done.wait (%p579_p4), %s435_s8, 128  }
 0x151   : > { %794 = vsyncadd (%p579_p4), %s435_s8, 4294967168  ;;  %s22_s23 = sadd.s32 1, %s817_s23   ;;  %s1021_s18 = smov %s801_s19 }
 0x152   : > { %p19_p7 = scmp.ge.s32.totalorder %s22_s23, 4   ;;  %s1022_s19 = smov %s805_s20 }
 0x153   : > { %s1023_s20 = smov %s932_s28  ;;  %s1024_s21 = smov %s813_s22 }
 0x154   : > { %s1025_s22 = smov %s1027_s14  ;;  %21 = sbr.rel (!%p19_p7) target bundleno = 7 (0x7), region = 102 }
 0x159   :  { %441 = vsyncpa [#allocation3], 1 }
 0x15a   :  { %443 = vsyncpa [#allocation3 + $0x1], 1 }
 0x15b   :  { %444 = vsyncpa [#allocation6], 1 }
 0x15c   :  { %445 = vsyncpa [#allocation4], 1 }
 0x15d   :  { %447 = vsyncpa [#allocation4 + $0x1], 1 }

</bundles_post_ra>
